<compile_context>
chip_gen: v6e
topology: v6e:2x2x1
jax: 0.10.0
libtpu: 0.0.40
codegen_flags: <defaults>
</compile_context>

<pallas_src>
import jax
import jax.numpy as jnp
from jax.experimental import pallas as pl
from jax.experimental.pallas import tpu as pltpu


def _round_up(a: int, b: int) -> int:
    return -(-a // b) * b


def _logreg_kernel(x_ref, wt_ref, b_ref, o_ref):
    # x_ref : (TILE_N, F)   row tile of the input (double-buffered)
    # wt_ref: (F, 1)        pre-transposed weight, resident across the grid
    # b_ref : (1, 1)        bias, resident
    # o_ref : (1, R, 128)   lane-dense output slab, R = TILE_N // 128
    r = o_ref.shape[1]
    h = jnp.dot(x_ref[...], wt_ref[...],
                preferred_element_type=jnp.float32)       # (TILE_N, 1) on MXU
    h = h + b_ref[...]                                    # broadcast bias
    # Fold the lane-sparse column into a lane-dense slab (XLU slot is idle here),
    # then do the sigmoid on dense vregs (exp on EUP, divide on VPU).
    hd = h.reshape(1, r, 128)
    o_ref[...] = (1.0 / (1.0 + jnp.exp(-hd))).astype(o_ref.dtype)


def _vmem_capacity_bytes() -> int:
    try:
        return int(pltpu.get_tpu_info().vmem_capacity_bytes)
    except Exception:
        return 64 * 1024 * 1024       # conservative default (v7x per-TC VMEM)


def _pick_tile_n(n: int, f: int, itemsize: int, vmem_cap: int) -> int:
    """Row tile: multiple of 128, sized by padded bytes, >= ~8 grid steps."""
    f_lanes = _round_up(f, 128)                       # lane padding in VMEM
    w_pad = 2 * _round_up(f, 8) * 128 * itemsize      # resident (F, 1) weight
    budget_total = min(int(vmem_cap * 0.6), 80 * 1024 * 1024)
    x_budget = min(8 * 1024 * 1024,
                   max(1 * 1024 * 1024, (budget_total - w_pad) // 2))
    rows = x_budget // max(1, f_lanes * itemsize)
    # Enough grid steps for pipelining / both TensorCores when N is large.
    rows = min(rows, max(128, pl.cdiv(n, 8)))
    tile = max(128, (rows // 128) * 128)
    # Never larger than the 128-rounded problem size.
    return min(tile, _round_up(n, 128))


def logistic_regression_forward(x: jax.Array, weight: jax.Array, bias: jax.Array,
                                *, tile_n: int | None = None) -> jax.Array:
    """x: (N, F), weight: (1, F), bias: (1,). Returns (N, 1) probabilities,
    matching Sigmoid()(Linear(n_features, 1)(x)) from the reference module."""
    n, f = x.shape
    itemsize = jnp.dtype(x.dtype).itemsize
    out_dtype = x.dtype
    out_itemsize = jnp.dtype(out_dtype).itemsize
    vmem_cap = _vmem_capacity_bytes()

    if tile_n is None:
        tile_n = _pick_tile_n(n, f, itemsize, vmem_cap)
    tile_n = max(128, (int(tile_n) // 128) * 128)     # lane-dense fold needs x128
    tile_n = min(tile_n, _round_up(n, 128))

    num_tiles = pl.cdiv(n, tile_n)
    r = tile_n // 128

    # Hoist the weight transpose out of the kernel: (1, F) -> (F, 1).
    wt = weight.reshape(f, 1).astype(x.dtype)
    b2d = bias.reshape(1, 1).astype(jnp.float32)

    # Padded VMEM footprint (lane dim -> 128, sublane dim -> 8, x2 buffers).
    vmem_need = (2 * tile_n * _round_up(f, 128) * itemsize             # x tiles
                 + 2 * _round_up(f, 8) * 128 * itemsize                # weight
                 + 2 * 8 * 128 * 4                                     # bias
                 + 2 * _round_up(r, 8) * 128 * out_itemsize)           # out slabs
    vmem_limit = int(min(max(vmem_need + (4 << 20), 16 << 20),
                         vmem_cap * 9 // 10))
    vmem_limit = max(vmem_limit, vmem_need + (1 << 20))

    out = pl.pallas_call(
        _logreg_kernel,
        out_shape=jax.ShapeDtypeStruct((num_tiles, r, 128), out_dtype),
        grid=(num_tiles,),
        in_specs=[
            pl.BlockSpec((tile_n, f), lambda i: (i, 0)),   # row tile (partial tail OK)
            pl.BlockSpec((f, 1), lambda i: (0, 0)),        # resident weight
            pl.BlockSpec((1, 1), lambda i: (0, 0)),        # resident bias
        ],
        out_specs=pl.BlockSpec((1, r, 128), lambda i: (i, 0, 0)),
        compiler_params=pltpu.CompilerParams(
            dimension_semantics=("parallel",),
            vmem_limit_bytes=int(vmem_limit),
        ),
        cost_estimate=pl.CostEstimate(
            flops=2 * n * f,
            transcendentals=n,
            bytes_accessed=n * f * itemsize + f * itemsize + 4 + n * out_itemsize,
        ),
    )(x, wt, b2d)

    # (G, R, 128) row-major flattens exactly in row-index order; drop padded tail.
    return out.reshape(num_tiles * tile_n, 1)[:n]


if __name__ == "__main__":
    # Small deterministic example; N chosen so the last grid block is partial.
    n_samples, n_features = 1000, 32

    key = jax.random.PRNGKey(0)
    kx, kw, kb = jax.random.split(key, 3)

    x = jax.random.normal(kx, (n_samples, n_features), dtype=jnp.float32)
    bound = 1.0 / (n_features ** 0.5)
    weight = jax.random.uniform(kw, (1, n_features), minval=-bound, maxval=bound,
                                dtype=jnp.float32)
    bias = jax.random.uniform(kb, (1,), minval=-bound, maxval=bound,
                              dtype=jnp.float32)

    ref = jax.nn.sigmoid(x @ weight.T + bias)                 # (N, 1)

    # Explicit small tile: 4 grid steps, last one partial (1000 = 3*256 + 232).
    out = jax.block_until_ready(
        logistic_regression_forward(x, weight, bias, tile_n=256))
    assert out.shape == (n_samples, 1)
    # Loose tolerance: XLA's default f32 matmul precision on TPU (bf16 passes)
    # can differ from the in-kernel MXU accumulation at the ~1e-4 level.
    err = float(jnp.max(jnp.abs(out - ref)))
    assert jnp.allclose(out, ref, atol=2e-3, rtol=0), err

    # Auto-sized tile path (bytes-based, per-generation VMEM budget).
    out2 = jax.block_until_ready(logistic_regression_forward(x, weight, bias))
    assert out2.shape == (n_samples, 1)
    err2 = float(jnp.max(jnp.abs(out2 - ref)))
    assert jnp.allclose(out2, ref, atol=2e-3, rtol=0), err2

    print("KERNEL_OK")
</pallas_src>

<mosaic_0001>
module attributes {stable_mosaic.version = 11 : i64} {
  func.func @_logreg_kernel(%arg0: i32, %arg1: memref<256x32xf32, #tpu.memory_space<vmem>>, %arg2: memref<32x1xf32, #tpu.memory_space<vmem>>, %arg3: memref<1x1xf32, #tpu.memory_space<vmem>>, %arg4: memref<1x2x128xf32, #tpu.memory_space<vmem>>) attributes {dimension_semantics = [#tpu.dimension_semantics<parallel>], iteration_bounds = array<i64: 4>, scalar_prefetch = 0 : i64, scratch_operands = 0 : i64, tpu.core_type = #tpu.core_type<tc>, window_params = [{transform_indices = @transform_0, window_bounds = array<i64: 256, 32>}, {pipeline_mode = #tpu.pipeline_mode<synchronous>, transform_indices = @transform_1, window_bounds = array<i64: 32, 1>}, {pipeline_mode = #tpu.pipeline_mode<synchronous>, transform_indices = @transform_2, window_bounds = array<i64: 1, 1>}, {transform_indices = @transform_3, window_bounds = array<i64: 1, 2, 128>}]} {
    %c0 = arith.constant 0 : index
    %c0_0 = arith.constant 0 : index
    %0 = vector.load %arg1[%c0, %c0_0] : memref<256x32xf32, #tpu.memory_space<vmem>>, vector<256x32xf32>
    %c0_1 = arith.constant 0 : index
    %c0_2 = arith.constant 0 : index
    %1 = vector.load %arg2[%c0_1, %c0_2] : memref<32x1xf32, #tpu.memory_space<vmem>>, vector<32x1xf32>
    %cst = arith.constant dense<0.000000e+00> : vector<256x1xf32>
    %2 = tpu.matmul %0, %1, %cst {dimension_numbers = #tpu.dot_dimension_numbers<[1], [0], [0], [1], [0, 0, 1, 1], [], []>} : vector<256x32xf32>, vector<32x1xf32>, vector<256x1xf32> -> vector<256x1xf32>
    %c0_3 = arith.constant 0 : index
    %c0_4 = arith.constant 0 : index
    %3 = vector.load %arg3[%c0_3, %c0_4] : memref<1x1xf32, #tpu.memory_space<vmem>>, vector<1x1xf32>
    %4 = vector.broadcast %3 : vector<1x1xf32> to vector<256x1xf32>
    %5 = arith.addf %2, %4 : vector<256x1xf32>
    %6 = vector.shape_cast %5 : vector<256x1xf32> to vector<1x2x128xf32>
    %cst_5 = arith.constant 0.000000e+00 : f32
    %7 = vector.broadcast %cst_5 : f32 to vector<1x2x128xf32>
    %8 = arith.subf %7, %6 : vector<1x2x128xf32>
    %9 = math.exp %8 : vector<1x2x128xf32>
    %cst_6 = arith.constant 1.000000e+00 : f32
    %10 = vector.broadcast %cst_6 : f32 to vector<1x2x128xf32>
    %11 = arith.addf %10, %9 : vector<1x2x128xf32>
    %cst_7 = arith.constant 1.000000e+00 : f32
    %12 = vector.broadcast %cst_7 : f32 to vector<1x2x128xf32>
    %13 = arith.divf %12, %11 : vector<1x2x128xf32>
    %c0_8 = arith.constant 0 : index
    %c0_9 = arith.constant 0 : index
    %c0_10 = arith.constant 0 : index
    %14 = vector.load %arg4[%c0_8, %c0_9, %c0_10] : memref<1x2x128xf32, #tpu.memory_space<vmem>>, vector<1x2x128xf32>
    tpu.vector_store %arg4[%c0_8, %c0_9, %c0_10], %13 {strides = array<i32>} : memref<1x2x128xf32, #tpu.memory_space<vmem>>, vector<1x2x128xf32>,
    return
  }
  func.func @transform_0(%arg0: i32) -> (i32, i32) {
    %c0_i32 = arith.constant 0 : i32
    %c0_i32_0 = arith.constant 0 : i32
    return %arg0, %c0_i32 : i32, i32
  }
  func.func @transform_1(%arg0: i32) -> (i32, i32) {
    %c0_i32 = arith.constant 0 : i32
    %c0_i32_0 = arith.constant 0 : i32
    %c0_i32_1 = arith.constant 0 : i32
    return %c0_i32, %c0_i32_0 : i32, i32
  }
  func.func @transform_2(%arg0: i32) -> (i32, i32) {
    %c0_i32 = arith.constant 0 : i32
    %c0_i32_0 = arith.constant 0 : i32
    %c0_i32_1 = arith.constant 0 : i32
    return %c0_i32, %c0_i32_0 : i32, i32
  }
  func.func @transform_3(%arg0: i32) -> (i32, i32, i32) {
    %c0_i32 = arith.constant 0 : i32
    %c0_i32_0 = arith.constant 0 : i32
    %c0_i32_1 = arith.constant 0 : i32
    return %arg0, %c0_i32, %c0_i32_0 : i32, i32, i32
  }
}

</mosaic_0001>

<bundles_post_ra>
// kernel: tpu_custom_call.1
= control target key start
LH: loop header
LB: loop body
LE: loop exit
PB: predicated region body
PF: predicated region fallthrough
CT: control target
= control target key end

     0   :  { %s1841_s0 = inlined_call_operand.vmem [shape: f32[1000,32], index: 0, kind: input, shape index: {}]   ;;  %s1842_s1 = inlined_call_operand.vmem [shape: f32[32,1], index: 1, kind: input, shape index: {}]   ;;  %s1843_s2 = inlined_call_operand.<no memory space> [shape: f32[1,1], index: 2, kind: input, shape index: {}]   ;;  %s1844_s3 = inlined_call_operand.hbm [shape: f32[4,2,128], index: 3, kind: output, shape index: {}]  }
   0x1   :  { %v8_v0 = vstv %s1843_s2 }
   0x2   :  { %9 = vst [vmem:[#allocation2] sm:$0x1] %v8_v0 }
   0x3   :  { %10 = vsyncpa [#allocation4], 0 }
   0x4   :  { %12 = vsyncpa [#allocation4 + $0x1], 0  ;;  %s1546_s14 = smov 0   ;;  %s1548_s15 = smov 0  }
   0x5   :  { %s1550_s16 = smov 0   ;;  %s1552_s17 = smov 0  }
   0x6 LB: > { %s1144_s2 = sadd.s32 4294967295, %s1519_s17   ;;  %s1145_s18 = sadd.s32 4294967294, %s1519_s17   ;;  %s1519_s17 = sphi %s1552_s17, %s1850_s17   ;;  %s1515_s16 = sphi %s1550_s16, %s1849_s16   ;;  %s1511_s15 = sphi %s1548_s15, %s1848_s15   ;;  %s1507_s14 = sphi %s1546_s14, %s1847_s14  }
   0x7   : > { %s1569_s19 = sadd.s32 1, %s1519_s17   ;;  %s93_s20 = sadd.s32 1, %s1515_s16 }
   0x8   : > { %s90_s21 = ssub.s32 %s1519_s17, %s1569_s19  ;;  %p103_p0 = scmp.ne.s32.totalorder %s1515_s16, %s1511_s15 }
   0x9   : > { %p91_p1 = scmp.eq.s32.totalorder %s90_s21, 0  ;;  %p104_p2 = scmp.eq.s32.totalorder %s1144_s2, 3 }
   0xa   : > { %p109_p3 = scmp.ne.s32.totalorder %s1511_s15, %s1507_s14  ;;  %p110_p4 = scmp.eq.s32.totalorder %s1145_s18, 3 }
   0xb   : > { %s1579_s22 = scalar_select %p91_p1, %s1515_s16, %s93_s20  }
   0xc   : > { %p1581_p5 = por %p104_p2, %p103_p0  ;;  %p1585_p6 = por %p110_p4, %p109_p3 }
   0xd   : > { %p1148_p7 = scmp.ge.s32.totalorder %s1519_s17, 1  ;;  %p151_p8 = scmp.lt.s32.totalorder %s1519_s17, 5 }
   0xf   : > { %p152_p9 = pnand %p1148_p7, %p151_p8 }
  0x10   : > { %s1597_s29 = sshll.u32 (!%p152_p9), %s1144_s2, 5  ;;  %s176_s12 = sand.u32 (!%p152_p9), 1, %s1511_s15  }
  0x11   : > { %155 = sbr.rel (%p152_p9) target bundleno = 463 (0x1cf), region = 32  ;;  %p184_p10 = scmp.lt.s32.totalorder (!%p152_p9), %s1597_s29, 124 }
  0x12   : > { %s1791_s13 = sshll.u32 (!%p152_p9), %s176_s12, 1  ;;  %s1804_s25 = scalar_lea.hbm (!%p152_p9), %s1844_s3, %s1597_s29 }
  0x13   : > { %s178_s2 = scalar_lea.vmem (!%p152_p9), [#allocation3], %s1791_s13  ;;  %s1073_s26 = scalar_lea.sflag (!%p152_p9), [#allocation4], %s176_s12 }
  0x14   : > { %s1086_s18 = sshll.u32 (!%p152_p9), %s178_s2, 4  ;;  %s1522_s28 = smov (!%p152_p9), [#allocation3]   ;;  %s1087_s18 = int_to_ptr.vmem [resolvable:$true] %s1086_s18 }
  0x15   : > { %s1459_s27 = scalar_lea.vmem (!%p152_p9), %s1087_s18, 32  ;;  %s1463_s30 = sshll.u32 (!%p152_p9), %s1522_s28, 4  ;;  %s1464_s30 = int_to_ptr.vmem [resolvable:$false] %s1463_s30 }
  0x16   : > { %v228_v1 = vld [vmem:[%s1842_s1 + $0x18] sm:$0xff]  ;;  %v227_v2 = vld [vmem:[%s1842_s1 + $0x10] sm:$0xff]  ;;  %v226_v3 = vld [vmem:[%s1842_s1 + $0x8] sm:$0xff]  ;;  %s185_s5 = scalar_select %p184_p10, %s1597_s29, 124  ;;  %vm236_vm0 = vcmask 261120   ;;  %v1521_v37 = vmov 0  }
  0x17   : > { %1225 = vmatprep.subr.mxu0 %v228_v1  ;;  %1281 = vmatprep.subr.mxu1 %v228_v1  ;;  %v225_v4 = vld [vmem:[%s1842_s1] sm:$0xff]  ;;  %vm889_vm1 = vcmask 130112   ;;  %vm896_vm2 = vcmask 195712   ;;  %vm903_vm3 = vcmask 261312   ;;  %vm910_vm4 = vcmask 326912   ;;  %p1460_p11 = scmp.ne.s32.totalorder %s1087_s18, %s1459_s27  ;;  %s1465_s4 = scalar_lea.vmem %s1464_s30, 64 }
  0x18   : > { %1226 = vmatpush3.msra.mxu0 %v228_v1  ;;  %1285 = vmatpush3.msra.mxu1 %v228_v1  ;;  %s1151_s8 = sshll.u32 %s185_s5, 3  ;;  %v1676_v38 = vld [vmem:[#allocation2] ss:$0 sm:$0xff]  ;;  %vm917_vm5 = vcmask 392512   ;;  %vm924_vm6 = vcmask 458112   ;;  %vm931_vm7 = vcmask 523712   ;;  %p1466_p0 = scmp.lt.s32.totalorder %s1087_s18, %s1464_s30 }
  0x19   : > { %1227 = vmatprep.subr.mxu0 %v227_v2  ;;  %1282 = vmatprep.subr.mxu1 %v227_v2  ;;  %s1610_s11 = scalar_lea.vmem %s1841_s0, %s1151_s8  ;;  %vm938_vm8 = vcmask 589312   ;;  %vm945_vm9 = vcmask 654912   ;;  %vm952_vm10 = vcmask 720512   ;;  %vm959_vm11 = vcmask 786112   ;;  %p1461_p12 = pnand %p1460_p11, %p1581_p5 }
  0x1a   : > { %1228 = vmatpush3.msra.mxu0 %v227_v2  ;;  %1286 = vmatpush3.msra.mxu1 %v227_v2  ;;  %v193_v5 = vld [vmem:[%s1610_s11] sm:$0xff]  ;;  %v194_v7 = vld [vmem:[%s1610_s11 + $0x8] sm:$0xff]  ;;  %v195_v9 = vld [vmem:[%s1610_s11 + $0x10] sm:$0xff]  ;;  %vm966_vm12 = vcmask 851712   ;;  %vm973_vm13 = vcmask 917312   ;;  %vm980_vm14 = vcmask 982912   ;;  %p1467_p1 = scmp.lt.s32.totalorder %s1465_s4, %s1459_s27 }
  0x1b   : > { %1229 = vmatprep.subr.mxu0 %v226_v3  ;;  %1283 = vmatprep.subr.mxu1 %v226_v3  ;;  %v209_v6 = vld [vmem:[%s1610_s11 + $0x80] sm:$0xff]  ;;  %v210_v8 = vld [vmem:[%s1610_s11 + $0x88] sm:$0xff]  ;;  %v211_v10 = vld [vmem:[%s1610_s11 + $0x90] sm:$0xff]  ;;  %vm987_vm15 = vcmask 1048512   ;;  %p1462_p13 = pneg %p1461_p12 }
  0x1c   : > { %1230 = vmatpush3.msra.mxu0 %v226_v3  ;;  %1287 = vmatpush3.msra.mxu1 %v226_v3  ;;  %v196_v11 = vld [vmem:[%s1610_s11 + $0x18] sm:$0xff]  ;;  %v197_v13 = vld [vmem:[%s1610_s11 + $0x20] sm:$0xff]  ;;  %v198_v15 = vld [vmem:[%s1610_s11 + $0x28] sm:$0xff]  ;;  %p1468_p2 = por %p1467_p1, %p1466_p0 }
  0x1d   : > { %1231 = vmatprep.subr.mxu0 %v225_v4  ;;  %1284 = vmatprep.subr.mxu1 %v225_v4  ;;  %v212_v12 = vld [vmem:[%s1610_s11 + $0x98] sm:$0xff]  ;;  %v213_v14 = vld [vmem:[%s1610_s11 + $0xa0] sm:$0xff]  ;;  %v214_v16 = vld [vmem:[%s1610_s11 + $0xa8] sm:$0xff] }
  0x1e   : > { %1232 = vmatpush3.msra.mxu0 %v225_v4  ;;  %1288 = vmatpush3.msra.mxu1 %v225_v4  ;;  %v199_v17 = vld [vmem:[%s1610_s11 + $0x30] sm:$0xff]  ;;  %v200_v19 = vld [vmem:[%s1610_s11 + $0x38] sm:$0xff]  ;;  %v201_v21 = vld [vmem:[%s1610_s11 + $0x40] sm:$0xff]  ;;  %p1469_p3 = pnand %p1468_p2, %p1462_p13 }
  0x1f   : > { %1233 = vmatprep.mubr.msk.f32.mxu0 %vm236_vm0, %v193_v5  ;;  %1257 = vmatprep.mubr.msk.f32.mxu1 %vm236_vm0, %v209_v6  ;;  %v215_v18 = vld [vmem:[%s1610_s11 + $0xb0] sm:$0xff]  ;;  %v216_v20 = vld [vmem:[%s1610_s11 + $0xb8] sm:$0xff]  ;;  %v217_v22 = vld [vmem:[%s1610_s11 + $0xc0] sm:$0xff] }
  0x20   : > { %1234 = vmatmul.mubr.msk.f32.vlgmr.msra.gmra.mxu0 %vm236_vm0, %v194_v7  ;;  %1258 = vmatmul.mubr.msk.f32.vlgmr.msra.gmra.mxu1 %vm236_vm0, %v210_v8  ;;  %v202_v23 = vld [vmem:[%s1610_s11 + $0x48] sm:$0xff]  ;;  %v203_v25 = vld [vmem:[%s1610_s11 + $0x50] sm:$0xff]  ;;  %v204_v27 = vld [vmem:[%s1610_s11 + $0x58] sm:$0xff] }
  0x21   : > { %1236 = vmatprep.mubr.msk.f32.mxu0 %vm236_vm0, %v195_v9  ;;  %1260 = vmatprep.mubr.msk.f32.mxu1 %vm236_vm0, %v211_v10  ;;  %v218_v24 = vld [vmem:[%s1610_s11 + $0xc8] sm:$0xff]  ;;  %v219_v26 = vld [vmem:[%s1610_s11 + $0xd0] sm:$0xff]  ;;  %v220_v28 = vld [vmem:[%s1610_s11 + $0xd8] sm:$0xff] }
  0x22   : > { %v205_v29 = vld [vmem:[%s1610_s11 + $0x60] sm:$0xff]  ;;  %v206_v31 = vld [vmem:[%s1610_s11 + $0x68] sm:$0xff]  ;;  %v207_v33 = vld [vmem:[%s1610_s11 + $0x70] sm:$0xff]  ;;  %1330 = vset.pattern.permute.xlu1 %v1521_v37  ;;  %1329 = vset.pattern.permute.xlu0 %v1521_v37 }
  0x23   : > { %v221_v30 = vld [vmem:[%s1610_s11 + $0xe0] sm:$0xff]  ;;  %v222_v32 = vld [vmem:[%s1610_s11 + $0xe8] sm:$0xff]  ;;  %v223_v34 = vld [vmem:[%s1610_s11 + $0xf0] sm:$0xff] }
  0x24   : > { %1237 = vmatmul.mubr.msk.f32.gmra.mxu0 %vm236_vm0, %v196_v11  ;;  %1261 = vmatmul.mubr.msk.f32.gmra.mxu1 %vm236_vm0, %v212_v12  ;;  %v208_v35 = vld [vmem:[%s1610_s11 + $0x78] sm:$0xff] }
  0x25   : > { %1239 = vmatprep.mubr.msk.f32.mxu0 %vm236_vm0, %v197_v13  ;;  %1263 = vmatprep.mubr.msk.f32.mxu1 %vm236_vm0, %v213_v14  ;;  %v224_v36 = vld [vmem:[%s1610_s11 + $0xf8] sm:$0xff] }
  0x28   : > { %1240 = vmatmul.mubr.msk.f32.gmra.mxu0 %vm236_vm0, %v198_v15  ;;  %1264 = vmatmul.mubr.msk.f32.gmra.mxu1 %vm236_vm0, %v214_v16 }
  0x29   : > { %1242 = vmatprep.mubr.msk.f32.mxu0 %vm236_vm0, %v199_v17  ;;  %1266 = vmatprep.mubr.msk.f32.mxu1 %vm236_vm0, %v215_v18 }
  0x2c   : > { %1243 = vmatmul.mubr.msk.f32.gmra.mxu0 %vm236_vm0, %v200_v19  ;;  %1267 = vmatmul.mubr.msk.f32.gmra.mxu1 %vm236_vm0, %v216_v20 }
  0x2d   : > { %1245 = vmatprep.mubr.msk.f32.mxu0 %vm236_vm0, %v201_v21  ;;  %1269 = vmatprep.mubr.msk.f32.mxu1 %vm236_vm0, %v217_v22 }
  0x30   : > { %1246 = vmatmul.mubr.msk.f32.gmra.mxu0 %vm236_vm0, %v202_v23  ;;  %1270 = vmatmul.mubr.msk.f32.gmra.mxu1 %vm236_vm0, %v218_v24 }
  0x31   : > { %1248 = vmatprep.mubr.msk.f32.mxu0 %vm236_vm0, %v203_v25  ;;  %1272 = vmatprep.mubr.msk.f32.mxu1 %vm236_vm0, %v219_v26 }
  0x34   : > { %1249 = vmatmul.mubr.msk.f32.gmra.mxu0 %vm236_vm0, %v204_v27  ;;  %1273 = vmatmul.mubr.msk.f32.gmra.mxu1 %vm236_vm0, %v220_v28 }
  0x35   : > { %1251 = vmatprep.mubr.msk.f32.mxu0 %vm236_vm0, %v205_v29  ;;  %1275 = vmatprep.mubr.msk.f32.mxu1 %vm236_vm0, %v221_v30 }
  0x38   : > { %1252 = vmatmul.mubr.msk.f32.gmra.mxu0 %vm236_vm0, %v206_v31  ;;  %1276 = vmatmul.mubr.msk.f32.gmra.mxu1 %vm236_vm0, %v222_v32 }
  0x39   : > { %1254 = vmatprep.mubr.msk.f32.mxu0 %vm236_vm0, %v207_v33  ;;  %1278 = vmatprep.mubr.msk.f32.mxu1 %vm236_vm0, %v223_v34 }
  0x3c   : > { %1255 = vmatmul.mubr.msk.f32.gmra.mxu0 %vm236_vm0, %v208_v35  ;;  %1279 = vmatmul.mubr.msk.f32.gmra.mxu1 %vm236_vm0, %v224_v36  ;;  %vm1068_vm0 = vcmask 1041409  }
  0xe0   : > { %v1235_v39 = vpop.f32.mrf.mxu0  ;;  %v1259_v40 = vpop.f32.mrf.mxu1 }
  0xe1   : > { %v405_v41 = vadd.f32 %v1235_v39, %v1676_v38  ;;  %v485_v42 = vadd.f32 %v1259_v40, %v1676_v38 }
  0xe2   : > { %v399_v43 = vpop.f32.mrf.mxu0  ;;  %v479_v44 = vpop.f32.mrf.mxu1 }
  0xe3   : > { %v559_v45 = vsub.f32 0.0, %v405_v41  ;;  %v575_v46 = vsub.f32 0.0, %v485_v42  ;;  %v400_v47 = vadd.f32 %v1676_v38, %v399_v43  ;;  %v480_v48 = vadd.f32 %v1676_v38, %v479_v44 }
  0xe4   : > { %v1238_v49 = vpop.f32.mrf.mxu0  ;;  %v1262_v50 = vpop.f32.mrf.mxu1 }
  0xe5   : > { %v592_v51 = vmul.f32 1.442695, %v559_v45  ;;  %v624_v52 = vmul.f32 1.442695, %v575_v46  ;;  %v558_v53 = vsub.f32 0.0, %v400_v47  ;;  %v574_v54 = vsub.f32 0.0, %v480_v48 }
  0xe6   : > { %v415_v55 = vadd.f32 %v1238_v49, %v1676_v38  ;;  %v409_v56 = vpop.f32.mrf.mxu0  ;;  %v495_v57 = vadd.f32 %v1262_v50, %v1676_v38  ;;  %v489_v58 = vpop.f32.mrf.mxu1 }
  0xe7   : > { %1331 = vpow2.f32 %v592_v51  ;;  %v590_v59 = vmul.f32 1.442695, %v558_v53  ;;  %v622_v60 = vmul.f32 1.442695, %v574_v54  ;;  %v410_v61 = vadd.f32 %v1676_v38, %v409_v56 }
  0xe8   : > { %1333 = vpow2.f32 %v624_v52  ;;  %v561_v62 = vsub.f32 0.0, %v415_v55  ;;  %v577_v63 = vsub.f32 0.0, %v495_v57  ;;  %v490_v0 = vadd.f32 %v1676_v38, %v489_v58  ;;  %v1241_v1 = vpop.f32.mrf.mxu0  ;;  %v1265_v2 = vpop.f32.mrf.mxu1 }
  0xe9   : > { %1335 = vpow2.f32 %v590_v59  ;;  %v560_v3 = vsub.f32 0.0, %v410_v61  ;;  %v425_v4 = vadd.f32 %v1241_v1, %v1676_v38  ;;  %v505_v5 = vadd.f32 %v1265_v2, %v1676_v38 }
  0xea   : > { %1337 = vpow2.f32 %v622_v60  ;;  %v596_v6 = vmul.f32 1.442695, %v561_v62  ;;  %v628_v7 = vmul.f32 1.442695, %v577_v63  ;;  %v576_v8 = vsub.f32 0.0, %v490_v0  ;;  %v419_v9 = vpop.f32.mrf.mxu0  ;;  %v499_v10 = vpop.f32.mrf.mxu1 }
  0xeb   : > { %v594_v11 = vmul.f32 1.442695, %v560_v3  ;;  %v563_v12 = vsub.f32 0.0, %v425_v4  ;;  %v420_v13 = vadd.f32 %v1676_v38, %v419_v9  ;;  %v579_v14 = vsub.f32 0.0, %v505_v5 }
  0xec   : > { %1339 = vpow2.f32 %v596_v6  ;;  %v626_v15 = vmul.f32 1.442695, %v576_v8  ;;  %v500_v16 = vadd.f32 %v1676_v38, %v499_v10  ;;  %v1244_v17 = vpop.f32.mrf.mxu0  ;;  %v1268_v18 = vpop.f32.mrf.mxu1 }
  0xed   : > { %1341 = vpow2.f32 %v594_v11  ;;  %v600_v19 = vmul.f32 1.442695, %v563_v12  ;;  %v562_v20 = vsub.f32 0.0, %v420_v13  ;;  %v632_v21 = vmul.f32 1.442695, %v579_v14 }
  0xee   : > { %1343 = vpow2.f32 %v628_v7  ;;  %v578_v22 = vsub.f32 0.0, %v500_v16  ;;  %v435_v23 = vadd.f32 %v1244_v17, %v1676_v38  ;;  %v429_v24 = vpop.f32.mrf.mxu0  ;;  %v509_v29 = vpop.f32.mrf.mxu1  ;;  %v515_v34 = vadd.f32 %v1268_v18, %v1676_v38 }
  0xef   : > { %1345 = vpow2.f32 %v626_v15  ;;  %v598_v25 = vmul.f32 1.442695, %v562_v20  ;;  %v430_v26 = vadd.f32 %v1676_v38, %v429_v24  ;;  %v510_v32 = vadd.f32 %v1676_v38, %v509_v29 }
  0xf0   : > { %1347 = vpow2.f32 %v600_v19  ;;  %v630_v27 = vmul.f32 1.442695, %v578_v22  ;;  %v565_v28 = vsub.f32 0.0, %v435_v23  ;;  %v1247_v35 = vpop.f32.mrf.mxu0  ;;  %v1271_v45 = vpop.f32.mrf.mxu1  ;;  %v581_v46 = vsub.f32 0.0, %v515_v34 }
  0xf1   : > { %1349 = vpow2.f32 %v598_v25  ;;  %v564_v31 = vsub.f32 0.0, %v430_v26  ;;  %v580_v44 = vsub.f32 0.0, %v510_v32  ;;  %v445_v55 = vadd.f32 %v1247_v35, %v1676_v38 }
  0xf2   : > { %1351 = vpow2.f32 %v632_v21  ;;  %v604_v30 = vmul.f32 1.442695, %v565_v28  ;;  %v439_v47 = vpop.f32.mrf.mxu0  ;;  %v519_v56 = vpop.f32.mrf.mxu1  ;;  %v636_v59 = vmul.f32 1.442695, %v581_v46  ;;  %v525_v63 = vadd.f32 %v1271_v45, %v1676_v38 }
  0xf3   : > { %1353 = vpow2.f32 %v630_v27  ;;  %v602_v41 = vmul.f32 1.442695, %v564_v31  ;;  %v634_v54 = vmul.f32 1.442695, %v580_v44  ;;  %v440_v60 = vadd.f32 %v1676_v38, %v439_v47 }
  0xf4   : > { %v1332_v33 = vpop.eup %1331  ;;  %1355 = vpow2.f32 %v604_v30  ;;  %v1250_v52 = vpop.f32.mrf.mxu0  ;;  %v520_v3 = vadd.f32 %v1676_v38, %v519_v56  ;;  %v567_v7 = vsub.f32 0.0, %v445_v55  ;;  %v583_v14 = vsub.f32 0.0, %v525_v63 }
  0xf5   : > { %v1334_v36 = vpop.eup %1333  ;;  %v655_v37 = vadd.f32 1.0, %v1332_v33  ;;  %v1274_v0 = vpop.f32.mrf.mxu1  ;;  %v566_v10 = vsub.f32 0.0, %v440_v60  ;;  %v455_v11 = vadd.f32 %v1250_v52, %v1676_v38 }
  0xf6   : > { %v1336_v39 = vpop.eup %1335  ;;  %v671_v40 = vadd.f32 1.0, %v1334_v36  ;;  %v449_v4 = vpop.f32.mrf.mxu0  ;;  %v582_v18 = vsub.f32 0.0, %v520_v3  ;;  %v608_v20 = vmul.f32 1.442695, %v567_v7  ;;  %v535_v21 = vadd.f32 %v1274_v0, %v1676_v38 }
  0xf7   : > { %v1338_v42 = vpop.eup %1337  ;;  %1357 = vrcp.f32 %v655_v37  ;;  %v654_v43 = vadd.f32 1.0, %v1336_v39  ;;  %v450_v15 = vadd.f32 %v1676_v38, %v449_v4  ;;  %v529_v16 = vpop.f32.mrf.mxu1  ;;  %v606_v24 = vmul.f32 1.442695, %v566_v10 }
  0xf8   : > { %1359 = vrcp.f32 %v671_v40  ;;  %v670_v49 = vadd.f32 1.0, %v1338_v42  ;;  %v1253_v12 = vpop.f32.mrf.mxu0  ;;  %v569_v25 = vsub.f32 0.0, %v455_v11  ;;  %v530_v26 = vadd.f32 %v1676_v38, %v529_v16 }
  0xf9   : > { %v1340_v48 = vpop.eup %1339  ;;  %1361 = vpow2.f32 %v602_v41  ;;  %v1277_v22 = vpop.f32.mrf.mxu1  ;;  %v640_v29 = vmul.f32 1.442695, %v583_v14  ;;  %v568_v30 = vsub.f32 0.0, %v450_v15  ;;  %v465_v31 = vadd.f32 %v1253_v12, %v1676_v38 }
  0xfa   : > { %v1342_v50 = vpop.eup %1341  ;;  %v657_v51 = vadd.f32 1.0, %v1340_v48  ;;  %1363 = vrcp.f32 %v654_v43  ;;  %v459_v27 = vpop.f32.mrf.mxu0  ;;  %v638_v32 = vmul.f32 1.442695, %v582_v18  ;;  %v545_v33 = vadd.f32 %v1277_v22, %v1676_v38 }
  0xfb   : > { %v1344_v53 = vpop.eup %1343  ;;  %v656_v62 = vadd.f32 1.0, %v1342_v50  ;;  %v585_v37 = vsub.f32 0.0, %v535_v21  ;;  %v539_v39 = vpop.f32.mrf.mxu1  ;;  %v612_v41 = vmul.f32 1.442695, %v569_v25  ;;  %v584_v42 = vsub.f32 0.0, %v530_v26 }
  0xfc   : > { %v1346_v57 = vpop.eup %1345  ;;  %1365 = vrcp.f32 %v657_v51  ;;  %v673_v58 = vadd.f32 1.0, %v1344_v53  ;;  %v1256_v34 = vpop.f32.mrf.mxu0  ;;  %v610_v44 = vmul.f32 1.442695, %v568_v30  ;;  %v571_v45 = vsub.f32 0.0, %v465_v31 }
  0xfd   : > { %v1348_v61 = vpop.eup %1347  ;;  %1367 = vrcp.f32 %v670_v49  ;;  %v672_v2 = vadd.f32 1.0, %v1346_v57  ;;  %v460_v46 = vadd.f32 %v1676_v38, %v459_v27  ;;  %v1280_v47 = vpop.f32.mrf.mxu1  ;;  %v587_v50 = vsub.f32 0.0, %v545_v33 }
  0xfe   : > { %v1350_v1 = vpop.eup %1349  ;;  %1369 = vrcp.f32 %v673_v58  ;;  %v659_v6 = vadd.f32 1.0, %v1348_v61  ;;  %v540_v51 = vadd.f32 %v1676_v38, %v539_v39  ;;  %v469_v52 = vpop.f32.mrf.mxu0  ;;  %v642_v56 = vmul.f32 1.442695, %v584_v42 }
  0xff   : > { %v1352_v5 = vpop.eup %1351  ;;  %1371 = vpow2.f32 %v634_v54  ;;  %v658_v9 = vadd.f32 1.0, %v1350_v1  ;;  %v644_v54 = vmul.f32 1.442695, %v585_v37  ;;  %v616_v58 = vmul.f32 1.442695, %v571_v45  ;;  %v549_v61 = vpop.f32.mrf.mxu1 }
 0x100   : > { %v1354_v8 = vpop.eup %1353  ;;  %1373 = vpow2.f32 %v636_v59  ;;  %v675_v13 = vadd.f32 1.0, %v1352_v5  ;;  %v570_v59 = vsub.f32 0.0, %v460_v46  ;;  %v470_v60 = vadd.f32 %v1676_v38, %v469_v52 }
 0x101   : > { %1375 = vrcp.f32 %v656_v62  ;;  %v674_v17 = vadd.f32 1.0, %v1354_v8  ;;  %v1356_v19 = vpop.eup %1355  ;;  %v648_v63 = vmul.f32 1.442695, %v587_v50  ;;  %v586_v0 = vsub.f32 0.0, %v540_v51 }
 0x102   : > { %1377 = vrcp.f32 %v672_v2  ;;  %v661_v36 = vadd.f32 1.0, %v1356_v19  ;;  %v550_v5 = vadd.f32 %v1676_v38, %v549_v61  ;;  %v614_v7 = vmul.f32 1.442695, %v570_v59 }
 0x103   : > { %1379 = vrcp.f32 %v659_v6  ;;  %v475_v8 = vadd.f32 %v1256_v34, %v1676_v38  ;;  %v646_v11 = vmul.f32 1.442695, %v586_v0  ;;  %v555_v12 = vadd.f32 %v1280_v47, %v1676_v38 }
 0x104   : > { %v1358_v23 = vpop.eup %1357  ;;  %1381 = vrcp.f32 %v658_v9  ;;  %v572_v9 = vsub.f32 0.0, %v470_v60  ;;  %v588_v15 = vsub.f32 0.0, %v550_v5 }
 0x105   : > { %v1360_v28 = vpop.eup %1359  ;;  %1383 = vrcp.f32 %v675_v13  ;;  %786 = vperm.xlu0 %1329, %v1358_v23   ;;  %v573_v18 = vsub.f32 0.0, %v475_v8  ;;  %v589_v22 = vsub.f32 0.0, %v555_v12 }
 0x106   : > { %1385 = vrcp.f32 %v674_v17  ;;  %834 = vperm.xlu1 %1330, %v1360_v28   ;;  %v1362_v35 = vpop.eup %1361  ;;  %v618_v19 = vmul.f32 1.442695, %v572_v9  ;;  %v650_v26 = vmul.f32 1.442695, %v588_v15 }
 0x107   : > { %1387 = vpow2.f32 %v608_v20  ;;  %v1364_v40 = vpop.eup %1363  ;;  %v660_v49 = vadd.f32 1.0, %v1362_v35  ;;  %v620_v28 = vmul.f32 1.442695, %v573_v18  ;;  %v652_v30 = vmul.f32 1.442695, %v589_v22 }
 0x108   : > { %1389 = vpow2.f32 %v606_v24 }
 0x109   : > { %v1366_v43 = vpop.eup %1365  ;;  %1391 = vpow2.f32 %v640_v29  ;;  %783 = vperm.xlu0 %1329, %v1364_v40  }
 0x10a   : > { %v1368_v48 = vpop.eup %1367  ;;  %1393 = vpow2.f32 %v638_v32  ;;  %792 = vperm.xlu1 %1330, %v1366_v43  }
 0x10b   : > { %v1370_v53 = vpop.eup %1369  ;;  %1395 = vrcp.f32 %v661_v36 }
 0x10c   : > { %v1372_v55 = vpop.eup %1371  ;;  %1397 = vpow2.f32 %v612_v41 }
 0x10d   : > { %v1374_v57 = vpop.eup %1373  ;;  %1399 = vpow2.f32 %v610_v44  ;;  %831 = vperm.xlu0 %1329, %v1368_v48   ;;  %v676_v2 = vadd.f32 1.0, %v1372_v55 }
 0x10e   : > { %v1376_v62 = vpop.eup %1375  ;;  %1401 = vrcp.f32 %v660_v49  ;;  %840 = vperm.xlu1 %1330, %v1370_v53   ;;  %v677_v4 = vadd.f32 1.0, %v1374_v57 }
 0x10f   : > { %v1378_v1 = vpop.eup %1377  ;;  %1403 = vpow2.f32 %v644_v54 }
 0x110   : > { %v1380_v3 = vpop.eup %1379  ;;  %1405 = vpow2.f32 %v642_v56 }
 0x111   : > { %v1382_v6 = vpop.eup %1381  ;;  %1407 = vpow2.f32 %v616_v58  ;;  %837 = vperm.xlu0 %1329, %v1378_v1  }
 0x112   : > { %v1384_v10 = vpop.eup %1383  ;;  %1409 = vpow2.f32 %v648_v63  ;;  %789 = vperm.xlu1 %1330, %v1376_v62  }
 0x113   : > { %v1386_v13 = vpop.eup %1385  ;;  %1411 = vrcp.f32 %v676_v2 }
 0x114   : > { %v1388_v14 = vpop.eup %1387  ;;  %1413 = vrcp.f32 %v677_v4 }
 0x115   : > { %v1390_v16 = vpop.eup %1389  ;;  %v663_v17 = vadd.f32 1.0, %v1388_v14  ;;  %1415 = vpow2.f32 %v614_v7  ;;  %795 = vperm.xlu0 %1329, %v1382_v6  }
 0x116   : > { %v1392_v20 = vpop.eup %1391  ;;  %v662_v21 = vadd.f32 1.0, %v1390_v16  ;;  %1417 = vpow2.f32 %v646_v11  ;;  %798 = vperm.xlu1 %1330, %v1380_v3  }
 0x117   : > { %v1394_v23 = vpop.eup %1393  ;;  %1419 = vrcp.f32 %v663_v17  ;;  %v679_v24 = vadd.f32 1.0, %v1392_v20 }
 0x118   : > { %v1396_v38 = vpop.eup %1395  ;;  %1421 = vrcp.f32 %v662_v21  ;;  %v678_v25 = vadd.f32 1.0, %v1394_v23 }
 0x119   : > { %v1398_v27 = vpop.eup %1397  ;;  %1423 = vpow2.f32 %v618_v19  ;;  %843 = vperm.xlu0 %1329, %v1386_v13   ;;  %v878_v19 = vlaneseq }
 0x11a   : > { %v1400_v29 = vpop.eup %1399  ;;  %1425 = vrcp.f32 %v679_v24  ;;  %846 = vperm.xlu1 %1330, %v1384_v10   ;;  %v665_v32 = vadd.f32 1.0, %v1398_v27 }
 0x11b   : > { %v1402_v31 = vpop.eup %1401  ;;  %1427 = vrcp.f32 %v678_v25  ;;  %v664_v34 = vadd.f32 1.0, %v1400_v29  ;;  %v1718_v22 = vand.u32 127, %v878_v19  ;;  %v1725_v25 = vshrl.u32 %v878_v19, 7 }
 0x11c   : > { %v1404_v33 = vpop.eup %1403  ;;  %1429 = vpow2.f32 %v650_v26 }
 0x11d   : > { %v1406_v35 = vpop.eup %1405  ;;  %1431 = vpow2.f32 %v620_v28  ;;  %801 = vperm.xlu0 %1329, %v1402_v31   ;;  %v681_v39 = vadd.f32 1.0, %v1404_v33  ;;  %v884_v26 = vadd.s32 4294967288, %v1718_v22  ;;  %v882_v29 = vsub.s32 %v1718_v22, %v1725_v25 }
 0x11e   : > { %v1408_v36 = vpop.eup %1407  ;;  %1433 = vpow2.f32 %v652_v30  ;;  %804 = vperm.xlu1 %1330, %v1396_v38   ;;  %v680_v41 = vadd.f32 1.0, %v1406_v35  ;;  %v891_v38 = vadd.s32 4294967280, %v1718_v22  ;;  %v905_v31 = vadd.s32 4294967264, %v1718_v22 }
 0x11f   : > { %v1410_v37 = vpop.eup %1409  ;;  %1435 = vrcp.f32 %v665_v32  ;;  %v667_v43 = vadd.f32 1.0, %v1408_v36  ;;  %v887_v32 = vsub.s32 %v884_v26, %v1725_v25  ;;  %v898_v33 = vadd.s32 4294967272, %v1718_v22 }
 0x120   : > { %v1412_v40 = vpop.eup %1411  ;;  %1437 = vrcp.f32 %v664_v34  ;;  %v683_v45 = vadd.f32 1.0, %v1410_v37  ;;  %v894_v30 = vsub.s32 %v891_v38, %v1725_v25  ;;  %v912_v34 = vadd.s32 4294967256, %v1718_v22 }
 0x121   : > { %v1414_v42 = vpop.eup %1413  ;;  %849 = vperm.xlu0 %1329, %v1412_v40   ;;  %1439 = vrcp.f32 %v681_v39  ;;  %v919_v40 = vadd.s32 4294967248, %v1718_v22 }
 0x122   : > { %v1416_v44 = vpop.eup %1415  ;;  %852 = vperm.xlu1 %1330, %v1414_v42   ;;  %1441 = vrcp.f32 %v680_v41 }
 0x123   : > { %v1418_v46 = vpop.eup %1417  ;;  %1443 = vrcp.f32 %v667_v43  ;;  %v666_v51 = vadd.f32 1.0, %v1416_v44  ;;  %v908_v43 = vsub.s32 %v905_v31, %v1725_v25  ;;  %v975_v31 = vadd.s32 4294967184, %v1718_v22 }
 0x124   : > { %v1420_v47 = vpop.eup %1419  ;;  %1445 = vrcp.f32 %v683_v45  ;;  %v682_v53 = vadd.f32 1.0, %v1418_v46  ;;  %v901_v46 = vsub.s32 %v898_v33, %v1725_v25 }
 0x125   : > { %v1422_v48 = vpop.eup %1421  ;;  %1447 = vrcp.f32 %v666_v51 }
 0x126   : > { %v1424_v49 = vpop.eup %1423  ;;  %810 = vperm.xlu1 %1330, %v1420_v47   ;;  %807 = vperm.xlu0 %1329, %v1422_v48   ;;  %1449 = vrcp.f32 %v682_v53  ;;  %v915_v47 = vsub.s32 %v912_v34, %v1725_v25  ;;  %v926_v48 = vadd.s32 4294967240, %v1718_v22 }
 0x127   : > { %v1426_v50 = vpop.eup %1425  ;;  %v668_v57 = vadd.f32 1.0, %v1424_v49  ;;  %v933_v49 = vadd.s32 4294967232, %v1718_v22 }
 0x128   : > { %v1428_v52 = vpop.eup %1427 }
 0x129   : > { %v1430_v54 = vpop.eup %1429  ;;  %1451 = vrcp.f32 %v668_v57 }
 0x12a   : > { %v1432_v55 = vpop.eup %1431  ;;  %858 = vperm.xlu1 %1330, %v1426_v50   ;;  %855 = vperm.xlu0 %1329, %v1428_v52   ;;  %v684_v59 = vadd.f32 1.0, %v1430_v54  ;;  %v922_v54 = vsub.s32 %v919_v40, %v1725_v25 }
 0x12b   : > { %v1434_v56 = vpop.eup %1433  ;;  %v669_v61 = vadd.f32 1.0, %v1432_v55 }
 0x12c   : > { %v1436_v58 = vpop.eup %1435  ;;  %v685_v63 = vadd.f32 1.0, %v1434_v56  ;;  %1453 = vrcp.f32 %v684_v59 }
 0x12d   : > { %v1438_v60 = vpop.eup %1437  ;;  %1455 = vrcp.f32 %v669_v61  ;;  %v929_v61 = vsub.s32 %v926_v48, %v1725_v25 }
 0x12e   : > { %816 = vperm.xlu1 %1330, %v1436_v58   ;;  %813 = vperm.xlu0 %1329, %v1438_v60   ;;  %v1440_v62 = vpop.eup %1439  ;;  %1457 = vrcp.f32 %v685_v63  ;;  %v936_v63 = vsub.s32 %v933_v49, %v1725_v25 }
 0x12f   : > { %v1442_v0 = vpop.eup %1441 }
 0x130   : > { %v1444_v1 = vpop.eup %1443 }
 0x131   : > { %v1446_v2 = vpop.eup %1445 }
 0x132   : > { %864 = vperm.xlu1 %1330, %v1440_v62   ;;  %861 = vperm.xlu0 %1329, %v1442_v0   ;;  %v1448_v3 = vpop.eup %1447  ;;  %v940_v62 = vadd.s32 4294967224, %v1718_v22 }
 0x133   : > { %v1450_v4 = vpop.eup %1449 }
 0x136   : > { %870 = vperm.xlu1 %1330, %v1446_v2   ;;  %822 = vperm.xlu0 %1329, %v1444_v1   ;;  %v1452_v5 = vpop.eup %1451  ;;  %v947_v1 = vadd.s32 4294967216, %v1718_v22 }
 0x139   : > { %v1454_v6 = vpop.eup %1453 }
 0x13a   : > { %867 = vperm.xlu1 %1330, %v1450_v4   ;;  %819 = vperm.xlu0 %1329, %v1448_v3   ;;  %v1456_v7 = vpop.eup %1455 }
 0x13b   : > { %v1458_v8 = vpop.eup %1457 }
 0x13e   : > { %873 = vperm.xlu1 %1330, %v1454_v6   ;;  %825 = vperm.xlu0 %1329, %v1452_v5  }
 0x142   : > { %876 = vperm.xlu1 %1330, %v1458_v8   ;;  %828 = vperm.xlu0 %1329, %v1456_v7  }
 0x180   : > { %v787_v9 = vpop.permute.xlu0 %786 }
 0x181   : > { %v835_v10 = vpop.permute.xlu1 %834  ;;  %v888_v45 = vrot.slane %v787_v9, %v887_v32 }
 0x182   : > { %v996_v44 = vrot.slane %v835_v10, %v887_v32 }
 0x184   : > { %v784_v11 = vpop.permute.xlu0 %783 }
 0x185   : > { %v1710_v12 = vpop.permute.xlu1 %792  ;;  %v883_v37 = vrot.slane %v784_v11, %v882_v29  ;;  %v943_v11 = vsub.s32 %v940_v62, %v1725_v25 }
 0x186   : > { %v902_v59 = vrot.slane %v1710_v12, %v901_v46  ;;  %v954_v12 = vadd.s32 4294967208, %v1718_v22 }
 0x187   : > { %v890_v52 = vsel %vm889_vm1, %v888_v45, %v883_v37 }
 0x188   : > { %v832_v13 = vpop.permute.xlu0 %831 }
 0x189   : > { %v1712_v14 = vpop.permute.xlu1 %840  ;;  %v992_v39 = vrot.slane %v832_v13, %v882_v29  ;;  %v950_v13 = vsub.s32 %v947_v1, %v1725_v25 }
 0x18a   : > { %v1006_v60 = vrot.slane %v1712_v14, %v901_v46 }
 0x18b   : > { %v997_v53 = vsel %vm889_vm1, %v996_v44, %v992_v39  ;;  %v982_v44 = vadd.s32 4294967176, %v1718_v22 }
 0x18c   : > { %v838_v15 = vpop.permute.xlu0 %837 }
 0x18d   : > { %v790_v16 = vpop.permute.xlu1 %789  ;;  %v1001_v42 = vrot.slane %v838_v15, %v894_v30 }
 0x18e   : > { %v895_v41 = vrot.slane %v790_v16, %v894_v30  ;;  %v961_v16 = vadd.s32 4294967200, %v1718_v22 }
 0x18f   : > { %v1002_v56 = vsel %vm896_vm2, %v1001_v42, %v997_v53 }
 0x190   : > { %v796_v17 = vpop.permute.xlu0 %795  ;;  %v897_v55 = vsel %vm896_vm2, %v895_v41, %v890_v52  ;;  %v1007_v6 = vsel %vm903_vm3, %v1006_v60, %v1002_v56  ;;  %v968_v41 = vadd.s32 4294967192, %v1718_v22 }
 0x191   : > { %v1714_v18 = vpop.permute.xlu1 %798  ;;  %v909_v57 = vrot.slane %v796_v17, %v908_v43  ;;  %v904_v4 = vsel %vm903_vm3, %v902_v59, %v897_v55 }
 0x192   : > { %v916_v3 = vrot.slane %v1714_v18, %v915_v47  ;;  %v971_v53 = vsub.s32 %v968_v41, %v1725_v25 }
 0x193   : > { %v911_v7 = vsel %vm910_vm4, %v909_v57, %v904_v4  ;;  %v985_v57 = vsub.s32 %v982_v44, %v1725_v25 }
 0x194   : > { %v844_v20 = vpop.permute.xlu0 %843  ;;  %v918_v18 = vsel %vm917_vm5, %v916_v3, %v911_v7 }
 0x195   : > { %v1716_v21 = vpop.permute.xlu1 %846  ;;  %v1011_v58 = vrot.slane %v844_v20, %v908_v43 }
 0x196   : > { %v1016_v5 = vrot.slane %v1716_v21, %v915_v47 }
 0x197   : > { %v1012_v8 = vsel %vm910_vm4, %v1011_v58, %v1007_v6 }
 0x198   : > { %v1720_v23 = vpop.permute.xlu0 %801  ;;  %v1017_v20 = vsel %vm917_vm5, %v1016_v5, %v1012_v8 }
 0x199   : > { %v1722_v24 = vpop.permute.xlu1 %804  ;;  %v923_v9 = vrot.slane %v1720_v23, %v922_v54 }
 0x19a   : > { %v930_v17 = vrot.slane %v1722_v24, %v929_v61  ;;  %v964_v24 = vsub.s32 %v961_v16, %v1725_v25 }
 0x19b   : > { %v925_v21 = vsel %vm924_vm6, %v923_v9, %v918_v18 }
 0x19c   : > { %v1728_v27 = vpop.permute.xlu0 %849  ;;  %v932_v32 = vsel %vm931_vm7, %v930_v17, %v925_v21 }
 0x19d   : > { %v1730_v28 = vpop.permute.xlu1 %852  ;;  %v1021_v10 = vrot.slane %v1728_v27, %v922_v54  ;;  %v957_v27 = vsub.s32 %v954_v12, %v1725_v25 }
 0x19e   : > { %v1026_v19 = vrot.slane %v1730_v28, %v929_v61 }
 0x19f   : > { %v1022_v23 = vsel %vm924_vm6, %v1021_v10, %v1017_v20 }
 0x1a0   : > { %v1027_v34 = vsel %vm931_vm7, %v1026_v19, %v1022_v23 }
 0x1a1   : > { %v1739_v35 = vpop.permute.xlu1 %810  ;;  %v1741_v36 = vpop.permute.xlu0 %807 }
 0x1a2   : > { %v937_v38 = vrot.slane %v1741_v36, %v936_v63  ;;  %v944_v28 = vrot.slane %v1739_v35, %v943_v11  ;;  %v978_v35 = vsub.s32 %v975_v31, %v1725_v25 }
 0x1a4   : > { %v939_v36 = vsel %vm938_vm8, %v937_v38, %v932_v32 }
 0x1a5   : > { %v1749_v50 = vpop.permute.xlu1 %858  ;;  %v856_v51 = vpop.permute.xlu0 %855  ;;  %v946_v46 = vsel %vm945_vm9, %v944_v28, %v939_v36 }
 0x1a6   : > { %v1031_v26 = vrot.slane %v856_v51, %v936_v63  ;;  %v1036_v33 = vrot.slane %v1749_v50, %v943_v11 }
 0x1a8   : > { %v1032_v37 = vsel %vm938_vm8, %v1031_v26, %v1027_v34 }
 0x1a9   : > { %v1757_v0 = vpop.permute.xlu1 %816  ;;  %v814_v2 = vpop.permute.xlu0 %813  ;;  %v1037_v48 = vsel %vm945_vm9, %v1036_v33, %v1032_v37 }
 0x1aa   : > { %v951_v39 = vrot.slane %v814_v2, %v950_v13  ;;  %v958_v45 = vrot.slane %v1757_v0, %v957_v27 }
 0x1ac   : > { %v953_v49 = vsel %vm952_vm10, %v951_v39, %v946_v46 }
 0x1ad   : > { %v865_v14 = vpop.permute.xlu1 %864  ;;  %v862_v15 = vpop.permute.xlu0 %861  ;;  %v960_v56 = vsel %vm959_vm11, %v958_v45, %v953_v49 }
 0x1ae   : > { %v1041_v40 = vrot.slane %v862_v15, %v950_v13  ;;  %v1046_v47 = vrot.slane %v865_v14, %v957_v27 }
 0x1b0   : > { %v1042_v50 = vsel %vm952_vm10, %v1041_v40, %v1037_v48 }
 0x1b1   : > { %v871_v29 = vpop.permute.xlu1 %870  ;;  %v823_v30 = vpop.permute.xlu0 %822  ;;  %v1047_v22 = vsel %vm959_vm11, %v1046_v47, %v1042_v50 }
 0x1b2   : > { %v1056_v62 = vrot.slane %v871_v29, %v971_v53  ;;  %v972_v63 = vrot.slane %v823_v30, %v971_v53 }
 0x1b5   : > { %v868_v42 = vpop.permute.xlu1 %867  ;;  %v820_v43 = vpop.permute.xlu0 %819 }
 0x1b6   : > { %v1051_v51 = vrot.slane %v868_v42, %v964_v24  ;;  %v965_v52 = vrot.slane %v820_v43, %v964_v24 }
 0x1b8   : > { %v1052_v58 = vsel %vm966_vm12, %v1051_v51, %v1047_v22  ;;  %v967_v59 = vsel %vm966_vm12, %v965_v52, %v960_v56 }
 0x1b9   : > { %v874_v54 = vpop.permute.xlu1 %873  ;;  %v826_v55 = vpop.permute.xlu0 %825  ;;  %v1057_v2 = vsel %vm973_vm13, %v1056_v62, %v1052_v58  ;;  %v974_v25 = vsel %vm973_vm13, %v972_v63, %v967_v59 }
 0x1ba   : > { %v1061_v60 = vrot.slane %v874_v54, %v978_v35  ;;  %v979_v61 = vrot.slane %v826_v55, %v978_v35 }
 0x1bc   : > { %v1062_v5 = vsel %vm980_vm14, %v1061_v60, %v1057_v2  ;;  %v981_v6 = vsel %vm980_vm14, %v979_v61, %v974_v25 }
 0x1bd   : > { %v877_v0 = vpop.permute.xlu1 %876  ;;  %v829_v1 = vpop.permute.xlu0 %828 }
 0x1be   : > { %v1066_v3 = vrot.slane %v877_v0, %v985_v57  ;;  %v986_v4 = vrot.slane %v829_v1, %v985_v57 }
 0x1c0   : > { %v1067_v7 = vsel %vm987_vm15, %v1066_v3, %v1062_v5  ;;  %v988_v8 = vsel %vm987_vm15, %v986_v4, %v981_v6 }
 0x1c1   : > { %v1069_v9 = vsel %vm1068_vm0, %v1067_v7, %v988_v8 }
 0x1c2   : > { %1071 = vst [vmem:[%s178_s2] sm:$0x3] %v1069_v9 }
 0x1c3   : > { %1472 = shalt.err (!%p1469_p3)
}
 0x1c4   : > { %s1473_s29 = scalar_lea.hbm %s1804_s25, 32  ;;  %s1477_s7 = scalar_lea.hbm %s1844_s3, 128 }
 0x1c5   : > { %p1474_p4 = scmp.ne.s32.totalorder %s1804_s25, %s1473_s29  ;;  %p1478_p9 = scmp.lt.s32.totalorder %s1804_s25, %s1844_s3 }
 0x1c6   : > { %p1479_p10 = scmp.lt.s32.totalorder %s1477_s7, %s1473_s29 }
 0x1c7   : > { %p1475_p7 = pnand %p1474_p4, %p1581_p5 }
 0x1c8   : > { %p1480_p11 = por %p1479_p10, %p1478_p9 }
 0x1c9   : > { %p1476_p8 = pneg %p1475_p7 }
 0x1cb   : > { %p1481_p12 = pnand %p1480_p11, %p1476_p8 }
 0x1cd   : > { %1484 = shalt.err (!%p1481_p12)
}
 0x1ce   : > { %1289 = dma.vmem_to_hbm [thread:$0]  (%p1581_p5), %s1087_s18, 32, %s1804_s25, %s1073_s26  }
 0x1cf PF: > { %p1295_p13 = scmp.ge.s32.totalorder %s1519_s17, 2  ;;  %s1098_s10 = sand.u32 1, %s1507_s14  }
 0x1d0   : > { %s1099_s11 = scalar_lea.sflag [#allocation4], %s1098_s10 }
 0x1d1   : > { %p1292_p0 = pnand %p1295_p13, %p1585_p6 }
 0x1d3   : > { %p1293_p1 = pneg %p1292_p0 }
 0x1d5   : > { %1502 = dma.done.wait (%p1293_p1), %s1099_s11, 32  }
 0x1d6   : > { %1504 = vsyncadd (%p1293_p1), %s1099_s11, 4294967264  ;;  %p15_p2 = scmp.ge.s32.totalorder %s1569_s19, 6   ;;  %s1847_s14 = smov %s1511_s15 }
 0x1d7   : > { %s1848_s15 = smov %s1515_s16  ;;  %s1849_s16 = smov %s1579_s22 }
 0x1d8   : > { %s1850_s17 = smov %s1569_s19  ;;  %17 = sbr.rel (!%p15_p2) target bundleno = 6 (0x6), region = 67 }
 0x1dd   :  { %1104 = vsyncpa [#allocation4], 1 }
 0x1de   :  { %1106 = vsyncpa [#allocation4 + $0x1], 1 }

</bundles_post_ra>
